<compile_context>
chip_gen: v7x
topology: tpu7x:2x2x1
jax: 0.10.0
libtpu: 0.0.40
codegen_flags: <defaults>
</compile_context>

<pallas_src>
import functools

import jax
import jax.numpy as jnp
from jax.experimental import pallas as pl
from jax.experimental.pallas import tpu as pltpu


IN_PAD = 8      # input features 4 -> 8   (sublane multiple)
H_PAD = 128     # hidden 64 -> 128        (full lane width)
OUT_PAD = 128   # output classes 2 -> 128 (lane-dense output slab)


def _policy_mlp_kernel(x_ref, w1_ref, b1_ref, w2_ref, b2_ref, w3_ref, b3_ref,
                       o_ref, *, out_real):
    x = x_ref[...]

    h1 = jnp.dot(x, w1_ref[...], preferred_element_type=jnp.float32) + b1_ref[...]
    h1 = jnp.maximum(h1, 0.0)

    h2 = jnp.dot(h1, w2_ref[...], preferred_element_type=jnp.float32) + b2_ref[...]
    h2 = jnp.maximum(h2, 0.0)

    logits = jnp.dot(h2, w3_ref[...], preferred_element_type=jnp.float32) + b3_ref[...]

    # Mask padded class lanes so exp() underflows to exactly 0: softmax over the
    # full 128-lane slab then equals softmax over the real `out_real` classes.
    lane = jax.lax.broadcasted_iota(jnp.int32, logits.shape, 1)
    logits = jnp.where(lane < out_real, logits, -1e30)

    m = jnp.max(logits, axis=-1, keepdims=True)
    e = jnp.exp(logits - m)
    denom = jnp.sum(e, axis=-1, keepdims=True)
    o_ref[...] = (e / denom).astype(o_ref.dtype)


def _round_up(x, m):
    return ((x + m - 1) // m) * m


def policy_network_forward(x, params, *, tb=256):
    """x: (B, input_dim) float32 -> (B, output_dim) float32 class probabilities."""
    w1, b1, w2, b2, w3, b3 = params
    in_dim, hidden = w1.shape
    out_dim = w3.shape[1]
    B = x.shape[0]
    f32 = jnp.float32

    # Zero-pad params & input to TPU-friendly shapes (inert for the math).
    w1p = jnp.zeros((IN_PAD, H_PAD), f32).at[:in_dim, :hidden].set(w1)
    b1p = jnp.zeros((1, H_PAD), f32).at[:, :hidden].set(b1)
    w2p = jnp.zeros((H_PAD, H_PAD), f32).at[:hidden, :hidden].set(w2)
    b2p = jnp.zeros((1, H_PAD), f32).at[:, :hidden].set(b2)
    w3p = jnp.zeros((H_PAD, OUT_PAD), f32).at[:hidden, :out_dim].set(w3)
    b3p = jnp.zeros((1, OUT_PAD), f32).at[:, :out_dim].set(b3)
    xp = jnp.zeros((B, IN_PAD), f32).at[:, :in_dim].set(x)

    tb = max(8, min(tb, _round_up(B, 8)))   # batch tile; clamp for tiny batches
    grid = (pl.cdiv(B, tb),)

    cost = pl.CostEstimate(
        flops=2 * B * (IN_PAD * H_PAD + H_PAD * H_PAD + H_PAD * OUT_PAD),
        transcendentals=B * OUT_PAD,
        bytes_accessed=4 * (xp.size + w1p.size + b1p.size + w2p.size
                            + b2p.size + w3p.size + b3p.size + B * OUT_PAD),
    )

    out_padded = pl.pallas_call(
        functools.partial(_policy_mlp_kernel, out_real=out_dim),
        out_shape=jax.ShapeDtypeStruct((B, OUT_PAD), f32),
        grid=grid,
        in_specs=[
            pl.BlockSpec((tb, IN_PAD), lambda i: (i, 0)),      # x batch tile
            pl.BlockSpec((IN_PAD, H_PAD), lambda i: (0, 0)),   # w1 (VMEM-resident)
            pl.BlockSpec((1, H_PAD), lambda i: (0, 0)),        # b1
            pl.BlockSpec((H_PAD, H_PAD), lambda i: (0, 0)),    # w2
            pl.BlockSpec((1, H_PAD), lambda i: (0, 0)),        # b2
            pl.BlockSpec((H_PAD, OUT_PAD), lambda i: (0, 0)),  # w3
            pl.BlockSpec((1, OUT_PAD), lambda i: (0, 0)),      # b3
        ],
        out_specs=pl.BlockSpec((tb, OUT_PAD), lambda i: (i, 0)),
        compiler_params=pltpu.CompilerParams(
            dimension_semantics=("parallel",)),
        cost_estimate=cost,
    )(xp, w1p, b1p, w2p, b2p, w3p, b3p)

    return out_padded[:, :out_dim]


def init_params(key, input_dim=4, hidden=64, output=2):
    """nn.Linear-style U(-1/sqrt(fan_in)) init.

    Weights are stored as (in_features, out_features) — transpose of PyTorch's
    (out, in) — so the kernel computes x @ W directly.  Biases are (1, out).
    """
    def linear(key, fan_in, fan_out):
        kw, kb = jax.random.split(key)
        bound = 1.0 / jnp.sqrt(float(fan_in))
        w = jax.random.uniform(kw, (fan_in, fan_out), jnp.float32, -bound, bound)
        b = jax.random.uniform(kb, (1, fan_out), jnp.float32, -bound, bound)
        return w, b

    k1, k2, k3 = jax.random.split(key, 3)
    w1, b1 = linear(k1, input_dim, hidden)
    w2, b2 = linear(k2, hidden, hidden)
    w3, b3 = linear(k3, hidden, output)
    return (w1, b1, w2, b2, w3, b3)


def _reference_forward(x, params):
    w1, b1, w2, b2, w3, b3 = params
    h1 = jnp.maximum(x @ w1 + b1, 0.0)
    h2 = jnp.maximum(h1 @ w2 + b2, 0.0)
    return jax.nn.softmax(h2 @ w3 + b3, axis=-1)


if __name__ == "__main__":
    key = jax.random.PRNGKey(0)
    k_params, k_x = jax.random.split(key)

    input_dim, hidden, output = 4, 64, 2
    batch = 8

    params = init_params(k_params, input_dim, hidden, output)
    x = jax.random.normal(k_x, (batch, input_dim), jnp.float32)

    y = policy_network_forward(x, params)
    y = jax.block_until_ready(y)

    y_ref = _reference_forward(x, params)
    assert y.shape == (batch, output)
    assert jnp.allclose(y, y_ref, atol=1e-5, rtol=1e-5), "mismatch vs reference"
    assert jnp.allclose(jnp.sum(y, axis=-1), 1.0, atol=1e-5), "rows must sum to 1"

    print("KERNEL_OK")
</pallas_src>

<mosaic_0001>
module attributes {stable_mosaic.version = 11 : i64} {
  func.func @_policy_mlp_kernel(%arg0: i32, %arg1: memref<8x8xf32, #tpu.memory_space<vmem>>, %arg2: memref<8x128xf32, #tpu.memory_space<vmem>>, %arg3: memref<1x128xf32, #tpu.memory_space<vmem>>, %arg4: memref<128x128xf32, #tpu.memory_space<vmem>>, %arg5: memref<1x128xf32, #tpu.memory_space<vmem>>, %arg6: memref<128x128xf32, #tpu.memory_space<vmem>>, %arg7: memref<1x128xf32, #tpu.memory_space<vmem>>, %arg8: memref<8x128xf32, #tpu.memory_space<vmem>>) attributes {dimension_semantics = [#tpu.dimension_semantics<parallel>], iteration_bounds = array<i64: 1>, scalar_prefetch = 0 : i64, scratch_operands = 0 : i64, tpu.core_type = #tpu.core_type<tc>, window_params = [{transform_indices = @transform_0, window_bounds = array<i64: 8, 8>}, {pipeline_mode = #tpu.pipeline_mode<synchronous>, transform_indices = @transform_1, window_bounds = array<i64: 8, 128>}, {pipeline_mode = #tpu.pipeline_mode<synchronous>, transform_indices = @transform_2, window_bounds = array<i64: 1, 128>}, {pipeline_mode = #tpu.pipeline_mode<synchronous>, transform_indices = @transform_3, window_bounds = array<i64: 128, 128>}, {pipeline_mode = #tpu.pipeline_mode<synchronous>, transform_indices = @transform_4, window_bounds = array<i64: 1, 128>}, {pipeline_mode = #tpu.pipeline_mode<synchronous>, transform_indices = @transform_5, window_bounds = array<i64: 128, 128>}, {pipeline_mode = #tpu.pipeline_mode<synchronous>, transform_indices = @transform_6, window_bounds = array<i64: 1, 128>}, {transform_indices = @transform_7, window_bounds = array<i64: 8, 128>}]} {
    %c0 = arith.constant 0 : index
    %c0_0 = arith.constant 0 : index
    %0 = vector.load %arg1[%c0, %c0_0] : memref<8x8xf32, #tpu.memory_space<vmem>>, vector<8x8xf32>
    %c0_1 = arith.constant 0 : index
    %c0_2 = arith.constant 0 : index
    %1 = vector.load %arg2[%c0_1, %c0_2] : memref<8x128xf32, #tpu.memory_space<vmem>>, vector<8x128xf32>
    %cst = arith.constant dense<0.000000e+00> : vector<8x128xf32>
    %2 = tpu.matmul %0, %1, %cst {dimension_numbers = #tpu.dot_dimension_numbers<[1], [0], [0], [1], [0, 0, 1, 1], [], []>} : vector<8x8xf32>, vector<8x128xf32>, vector<8x128xf32> -> vector<8x128xf32>
    %c0_3 = arith.constant 0 : index
    %c0_4 = arith.constant 0 : index
    %3 = vector.load %arg3[%c0_3, %c0_4] : memref<1x128xf32, #tpu.memory_space<vmem>>, vector<1x128xf32>
    %4 = vector.broadcast %3 : vector<1x128xf32> to vector<8x128xf32>
    %5 = arith.addf %2, %4 : vector<8x128xf32>
    %cst_5 = arith.constant 0.000000e+00 : f32
    %6 = vector.broadcast %cst_5 : f32 to vector<8x128xf32>
    %7 = arith.maximumf %5, %6 : vector<8x128xf32>
    %c0_6 = arith.constant 0 : index
    %c0_7 = arith.constant 0 : index
    %8 = vector.load %arg4[%c0_6, %c0_7] : memref<128x128xf32, #tpu.memory_space<vmem>>, vector<128x128xf32>
    %cst_8 = arith.constant dense<0.000000e+00> : vector<8x128xf32>
    %9 = tpu.matmul %7, %8, %cst_8 {dimension_numbers = #tpu.dot_dimension_numbers<[1], [0], [0], [1], [0, 0, 1, 1], [], []>} : vector<8x128xf32>, vector<128x128xf32>, vector<8x128xf32> -> vector<8x128xf32>
    %c0_9 = arith.constant 0 : index
    %c0_10 = arith.constant 0 : index
    %10 = vector.load %arg5[%c0_9, %c0_10] : memref<1x128xf32, #tpu.memory_space<vmem>>, vector<1x128xf32>
    %11 = vector.broadcast %10 : vector<1x128xf32> to vector<8x128xf32>
    %12 = arith.addf %9, %11 : vector<8x128xf32>
    %cst_11 = arith.constant 0.000000e+00 : f32
    %13 = vector.broadcast %cst_11 : f32 to vector<8x128xf32>
    %14 = arith.maximumf %12, %13 : vector<8x128xf32>
    %c0_12 = arith.constant 0 : index
    %c0_13 = arith.constant 0 : index
    %15 = vector.load %arg6[%c0_12, %c0_13] : memref<128x128xf32, #tpu.memory_space<vmem>>, vector<128x128xf32>
    %cst_14 = arith.constant dense<0.000000e+00> : vector<8x128xf32>
    %16 = tpu.matmul %14, %15, %cst_14 {dimension_numbers = #tpu.dot_dimension_numbers<[1], [0], [0], [1], [0, 0, 1, 1], [], []>} : vector<8x128xf32>, vector<128x128xf32>, vector<8x128xf32> -> vector<8x128xf32>
    %c0_15 = arith.constant 0 : index
    %c0_16 = arith.constant 0 : index
    %17 = vector.load %arg7[%c0_15, %c0_16] : memref<1x128xf32, #tpu.memory_space<vmem>>, vector<1x128xf32>
    %18 = vector.broadcast %17 : vector<1x128xf32> to vector<8x128xf32>
    %19 = arith.addf %16, %18 : vector<8x128xf32>
    %20 = tpu.iota {dimensions = array<i32: 1>} : vector<8x128xi32>
    %c2_i32 = arith.constant 2 : i32
    %21 = vector.broadcast %c2_i32 : i32 to vector<8x128xi32>
    %22 = arith.cmpi slt, %20, %21 : vector<8x128xi32>
    %cst_17 = arith.constant -1.000000e+30 : f32
    %23 = vector.broadcast %cst_17 : f32 to vector<8x128xf32>
    %24 = arith.select %22, %19, %23 : vector<8x128xi1>, vector<8x128xf32>
    %cst_18 = arith.constant dense<0xFF800000> : vector<8xf32>
    %25 = vector.multi_reduction <maximumf>, %24, %cst_18 [1] : vector<8x128xf32> to vector<8xf32>
    %26 = vector.shape_cast %25 : vector<8xf32> to vector<8x1xf32>
    %27 = vector.broadcast %26 : vector<8x1xf32> to vector<8x128xf32>
    %28 = arith.subf %24, %27 : vector<8x128xf32>
    %29 = math.exp %28 : vector<8x128xf32>
    %cst_19 = arith.constant dense<0.000000e+00> : vector<8xf32>
    %30 = vector.multi_reduction <add>, %29, %cst_19 [1] : vector<8x128xf32> to vector<8xf32>
    %31 = vector.shape_cast %30 : vector<8xf32> to vector<8x1xf32>
    %32 = vector.broadcast %31 : vector<8x1xf32> to vector<8x128xf32>
    %33 = arith.divf %29, %32 : vector<8x128xf32>
    %c0_20 = arith.constant 0 : index
    %c0_21 = arith.constant 0 : index
    %34 = vector.load %arg8[%c0_20, %c0_21] : memref<8x128xf32, #tpu.memory_space<vmem>>, vector<8x128xf32>
    tpu.vector_store %arg8[%c0_20, %c0_21], %33 {strides = array<i32>} : memref<8x128xf32, #tpu.memory_space<vmem>>, vector<8x128xf32>,
    return
  }
  func.func @transform_0(%arg0: i32) -> (i32, i32) {
    %c0_i32 = arith.constant 0 : i32
    %c0_i32_0 = arith.constant 0 : i32
    return %arg0, %c0_i32 : i32, i32
  }
  func.func @transform_1(%arg0: i32) -> (i32, i32) {
    %c0_i32 = arith.constant 0 : i32
    %c0_i32_0 = arith.constant 0 : i32
    %c0_i32_1 = arith.constant 0 : i32
    return %c0_i32, %c0_i32_0 : i32, i32
  }
  func.func @transform_2(%arg0: i32) -> (i32, i32) {
    %c0_i32 = arith.constant 0 : i32
    %c0_i32_0 = arith.constant 0 : i32
    %c0_i32_1 = arith.constant 0 : i32
    return %c0_i32, %c0_i32_0 : i32, i32
  }
  func.func @transform_3(%arg0: i32) -> (i32, i32) {
    %c0_i32 = arith.constant 0 : i32
    %c0_i32_0 = arith.constant 0 : i32
    %c0_i32_1 = arith.constant 0 : i32
    return %c0_i32, %c0_i32_0 : i32, i32
  }
  func.func @transform_4(%arg0: i32) -> (i32, i32) {
    %c0_i32 = arith.constant 0 : i32
    %c0_i32_0 = arith.constant 0 : i32
    %c0_i32_1 = arith.constant 0 : i32
    return %c0_i32, %c0_i32_0 : i32, i32
  }
  func.func @transform_5(%arg0: i32) -> (i32, i32) {
    %c0_i32 = arith.constant 0 : i32
    %c0_i32_0 = arith.constant 0 : i32
    %c0_i32_1 = arith.constant 0 : i32
    return %c0_i32, %c0_i32_0 : i32, i32
  }
  func.func @transform_6(%arg0: i32) -> (i32, i32) {
    %c0_i32 = arith.constant 0 : i32
    %c0_i32_0 = arith.constant 0 : i32
    %c0_i32_1 = arith.constant 0 : i32
    return %c0_i32, %c0_i32_0 : i32, i32
  }
  func.func @transform_7(%arg0: i32) -> (i32, i32) {
    %c0_i32 = arith.constant 0 : i32
    %c0_i32_0 = arith.constant 0 : i32
    return %arg0, %c0_i32 : i32, i32
  }
}

</mosaic_0001>

<bundles_post_ra>
// kernel: tpu_custom_call.1
= control target key start
LH: loop header
LB: loop body
LE: loop exit
PB: predicated region body
PF: predicated region fallthrough
CT: control target
= control target key end

     0   :  { %12 = vsyncpa [#allocation3], 0  ;;  %s813_s0 = inlined_call_operand.hbm [shape: f32[8,8], index: 0, kind: input, shape index: {}]   ;;  %s814_s1 = inlined_call_operand.hbm [shape: f32[8,128], index: 1, kind: input, shape index: {}]   ;;  %s815_s2 = inlined_call_operand.vmem [shape: f32[1,128], index: 2, kind: input, shape index: {}]   ;;  %s816_s3 = inlined_call_operand.hbm [shape: f32[128,128], index: 3, kind: input, shape index: {}]   ;;  %s817_s4 = inlined_call_operand.vmem [shape: f32[1,128], index: 4, kind: input, shape index: {}]   ;;  %s818_s5 = inlined_call_operand.hbm [shape: f32[128,128], index: 5, kind: input, shape index: {}]   ;;  %s819_s6 = inlined_call_operand.vmem [shape: f32[1,128], index: 6, kind: input, shape index: {}]   ;;  %s820_s7 = inlined_call_operand.hbm [shape: f32[8,128], index: 7, kind: output, shape index: {}]  }
   0x1   :  { %13 = vsyncpa [#allocation6], 0 }
   0x2   :  { %14 = vsyncpa [#allocation9], 0 }
   0x3   :  { %15 = vsyncpa [#allocation4], 0  ;;  %s675_s24 = smov [#allocation5]   ;;  %s676_s26 = smov [#allocation2]  }
   0x4   :  { %s32_s25 = sshll.u32 %s675_s24, 4  ;;  %s22_s27 = sshll.u32 %s676_s26, 4  ;;  %s33_s25 = int_to_ptr.vmem [resolvable:$true] %s32_s25  ;;  %s23_s27 = int_to_ptr.vmem [resolvable:$true] %s22_s27 }
   0x5   :  { %s557_s30 = scalar_lea.hbm %s814_s1, 128 }
   0x6   :  { %p558_p0 = scmp.ne.s32.totalorder %s814_s1, %s557_s30  ;;  %p561_p1 = scmp.lt.u32.totalorder %s557_s30, %s814_s1 }
   0x8   :  { %p563_p2 = pnand %p561_p1, %p558_p0 }
   0xa   :  { %566 = shalt.err (!%p563_p2)
}
   0xb   :  { %s567_s12 = scalar_lea.vmem %s33_s25, 128  ;;  %p572_p4 = scmp.lt.s32.totalorder %s33_s25, %s33_s25 }
   0xc   :  { %p568_p3 = scmp.ne.s32.totalorder %s33_s25, %s567_s12  ;;  %p573_p5 = scmp.lt.s32.totalorder %s567_s12, %s567_s12 }
   0xe   :  { %p574_p6 = por %p573_p5, %p572_p4 }
  0x10   :  { %p575_p7 = pnand %p574_p6, %p568_p3 }
  0x12   :  { %578 = shalt.err (!%p575_p7)
}
  0x13   :  { %35 = dma.hbm_to_vmem [thread:$0]  %s814_s1, 128, %s33_s25, [#allocation6]  }
  0x14   :  { %s579_s17 = scalar_lea.hbm %s813_s0, 128 }
  0x15   :  { %p580_p8 = scmp.ne.s32.totalorder %s813_s0, %s579_s17  ;;  %p583_p9 = scmp.lt.u32.totalorder %s579_s17, %s813_s0 }
  0x17   :  { %p585_p10 = pnand %p583_p9, %p580_p8 }
  0x19   :  { %588 = shalt.err (!%p585_p10)
}
  0x1a   :  { %s589_s22 = scalar_lea.vmem %s23_s27, 128  ;;  %p594_p12 = scmp.lt.s32.totalorder %s23_s27, %s23_s27 }
  0x1b   :  { %p590_p11 = scmp.ne.s32.totalorder %s23_s27, %s589_s22  ;;  %p595_p13 = scmp.lt.s32.totalorder %s589_s22, %s589_s22 }
  0x1d   :  { %p596_p0 = por %p595_p13, %p594_p12 }
  0x1f   :  { %p597_p1 = pnand %p596_p0, %p590_p11 }
  0x21   :  { %600 = shalt.err (!%p597_p1)
}
  0x22   :  { %25 = dma.hbm_to_vmem [thread:$0]  %s813_s0, 128, %s23_s27, [#allocation3]  }
  0x23   :  { %s677_s24 = smov [#allocation7]   ;;  %s601_s29 = scalar_lea.hbm %s816_s3, 2048 }
  0x24   :  { %s43_s25 = sshll.u32 %s677_s24, 4  ;;  %p602_p2 = scmp.ne.s32.totalorder %s816_s3, %s601_s29  ;;  %s44_s25 = int_to_ptr.vmem [resolvable:$true] %s43_s25 }
  0x25   :  { %p605_p3 = scmp.lt.u32.totalorder %s601_s29, %s816_s3 }
  0x27   :  { %p607_p4 = pnand %p605_p3, %p602_p2 }
  0x29   :  { %610 = shalt.err (!%p607_p4)
}
  0x2a   :  { %s611_s11 = scalar_lea.vmem %s44_s25, 2048  ;;  %p616_p6 = scmp.lt.s32.totalorder %s44_s25, %s44_s25 }
  0x2b   :  { %p612_p5 = scmp.ne.s32.totalorder %s44_s25, %s611_s11  ;;  %p617_p7 = scmp.lt.s32.totalorder %s611_s11, %s611_s11 }
  0x2d   :  { %p618_p8 = por %p617_p7, %p616_p6 }
  0x2f   :  { %p619_p9 = pnand %p618_p8, %p612_p5 }
  0x31   :  { %622 = shalt.err (!%p619_p9)
}
  0x32   :  { %s678_s0 = smov 128   ;;  %s679_s27 = smov 8  }
  0x33   :  { %49 = dma.hbm_to_vmem [thread:$0]  %s816_s3, 2048, %s44_s25, [#allocation6], %s678_s0, %s678_s0, %s679_s27  }
  0x34   :  { %s680_s14 = smov [#allocation8]   ;;  %s623_s18 = scalar_lea.hbm %s818_s5, 2048 }
  0x35   :  { %s57_s15 = sshll.u32 %s680_s14, 4  ;;  %p624_p10 = scmp.ne.s32.totalorder %s818_s5, %s623_s18  ;;  %s58_s15 = int_to_ptr.vmem [resolvable:$true] %s57_s15 }
  0x36   :  { %p627_p11 = scmp.lt.u32.totalorder %s623_s18, %s818_s5 }
  0x38   :  { %p629_p12 = pnand %p627_p11, %p624_p10 }
  0x3a   :  { %632 = shalt.err (!%p629_p12)
}
  0x3b   :  { %s633_s1 = scalar_lea.vmem %s58_s15, 2048  ;;  %p638_p0 = scmp.lt.s32.totalorder %s58_s15, %s58_s15 }
  0x3c   :  { %p634_p13 = scmp.ne.s32.totalorder %s58_s15, %s633_s1  ;;  %p639_p1 = scmp.lt.s32.totalorder %s633_s1, %s633_s1 }
  0x3e   :  { %p640_p2 = por %p639_p1, %p638_p0 }
  0x40   :  { %p641_p3 = pnand %p640_p2, %p634_p13 }
  0x42   :  { %644 = shalt.err (!%p641_p3)
}
  0x43   :  { %63 = dma.hbm_to_vmem [thread:$0]  %s818_s5, 2048, %s58_s15, [#allocation9], %s678_s0, %s678_s0, %s679_s27  }
  0x44   :  { %667 = dma.done.wait [#allocation3], 128  }
  0x45   :  { %668 = vsyncadd [#allocation3], 4294967168 }
  0x46   :  { %669 = dma.done.wait [#allocation6], 2176  }
  0x47   :  { %670 = vsyncadd [#allocation6], 4294965120 }
  0x48   :  { %671 = dma.done.wait [#allocation9], 2048  }
  0x49   :  { %672 = vsyncadd [#allocation9], 4294965248  ;;  %v681_v0 = vmov 0.0   ;;  %vm682_vm0 = vmmov 0   ;;  %v683_v1 = vmov 0.0|0.0   ;;  %vm87_vm1 = vcmask 64512  }
  0x4a   :  { %420 = vmatprep.subr.mxu0 %v681_v0  ;;  %422 = vmatprep.mubr.msk.f32.mxu0 %vm682_vm0, %v681_v0  ;;  %v79_v2 = vld [vmem:[#allocation5] sm:$0xff]  ;;  %v78_v3 = vld [vmem:[#allocation2] sm:$0xff]  ;;  %v162_v4 = vld [vmem:[#allocation7] sm:$0xff]  ;;  %v349_v62 = vlaneseq }
  0x4b   :  { %495 = vmatprep.subr.bf16.mxu1 %v683_v1  ;;  %457 = vmatprep.mubr.msk.f32.mxu1 %vm682_vm0, %v681_v0  ;;  %v163_v5 = vld [vmem:[#allocation7 + $0x8] sm:$0xff]  ;;  %v164_v6 = vld [vmem:[#allocation7 + $0x10] sm:$0xff]  ;;  %v165_v7 = vld [vmem:[#allocation7 + $0x18] sm:$0xff] }
  0x4c   :  { %421 = vmatpush3.msra.mxu0 %v79_v2  ;;  %v496_v8 = vpack.c.bf16 %v163_v5, %v162_v4  ;;  %v499_v9 = vpack.c.bf16 %v165_v7, %v164_v6  ;;  %v166_v10 = vld [vmem:[#allocation7 + $0x20] sm:$0xff]  ;;  %v167_v11 = vld [vmem:[#allocation7 + $0x28] sm:$0xff]  ;;  %v168_v13 = vld [vmem:[#allocation7 + $0x30] sm:$0xff]  ;;  %v350_v63 = vand.u32 127, %v349_v62 }
  0x4d   :  { %423 = vmatmul.mubr.msk.f32.vlgmr.msra.gmra.mrb[0].mxu0 %vm87_vm1, %v78_v3  ;;  %519 = vmatprep.subr.bf16.mxu0 %v683_v1  ;;  %v502_v12 = vpack.c.bf16 %v167_v11, %v166_v10  ;;  %v169_v14 = vld [vmem:[#allocation7 + $0x38] sm:$0xff]  ;;  %v170_v16 = vld [vmem:[#allocation7 + $0x40] sm:$0xff]  ;;  %v171_v17 = vld [vmem:[#allocation7 + $0x48] sm:$0xff] }
  0x4e   :  { %492 = vmatprep.mubr.msk.f32.mxu0 %vm682_vm0, %v681_v0  ;;  %497 = vmatpush3.bf16.msra.mxu1 %v496_v8  ;;  %v505_v15 = vpack.c.bf16 %v169_v14, %v168_v13  ;;  %v508_v18 = vpack.c.bf16 %v171_v17, %v170_v16  ;;  %v172_v19 = vld [vmem:[#allocation7 + $0x50] sm:$0xff]  ;;  %v173_v20 = vld [vmem:[#allocation7 + $0x58] sm:$0xff]  ;;  %v174_v22 = vld [vmem:[#allocation7 + $0x60] sm:$0xff]  ;;  %vm351_vm2 = vcmp.lt.s32.totalorder %v350_v63, 2 }
  0x4f   :  { %498 = vmatprep.subr.bf16.mxu1 %v683_v1  ;;  %v511_v21 = vpack.c.bf16 %v173_v20, %v172_v19  ;;  %v175_v23 = vld [vmem:[#allocation7 + $0x68] sm:$0xff]  ;;  %v176_v25 = vld [vmem:[#allocation7 + $0x70] sm:$0xff]  ;;  %v177_v26 = vld [vmem:[#allocation7 + $0x78] sm:$0xff] }
  0x50   :  { %v514_v24 = vpack.c.bf16 %v175_v23, %v174_v22  ;;  %v517_v27 = vpack.c.bf16 %v177_v26, %v176_v25  ;;  %v256_v28 = vld [vmem:[#allocation8] sm:$0xff]  ;;  %v257_v29 = vld [vmem:[#allocation8 + $0x8] sm:$0xff]  ;;  %v258_v30 = vld [vmem:[#allocation8 + $0x10] sm:$0xff] }
  0x51   :  { %v520_v31 = vpack.c.bf16 %v257_v29, %v256_v28  ;;  %v259_v32 = vld [vmem:[#allocation8 + $0x18] sm:$0xff]  ;;  %v260_v34 = vld [vmem:[#allocation8 + $0x20] sm:$0xff]  ;;  %v261_v35 = vld [vmem:[#allocation8 + $0x28] sm:$0xff] }
  0x52   :  { %500 = vmatpush3.bf16.msra.mxu1 %v499_v9  ;;  %v523_v33 = vpack.c.bf16 %v259_v32, %v258_v30  ;;  %v526_v36 = vpack.c.bf16 %v261_v35, %v260_v34  ;;  %v262_v37 = vld [vmem:[#allocation8 + $0x30] sm:$0xff]  ;;  %v263_v38 = vld [vmem:[#allocation8 + $0x38] sm:$0xff]  ;;  %v264_v40 = vld [vmem:[#allocation8 + $0x40] sm:$0xff] }
  0x53   :  { %501 = vmatprep.subr.bf16.mxu1 %v683_v1  ;;  %521 = vmatpush3.bf16.msra.mxu0 %v520_v31  ;;  %v529_v39 = vpack.c.bf16 %v263_v38, %v262_v37  ;;  %v265_v41 = vld [vmem:[#allocation8 + $0x48] sm:$0xff]  ;;  %v266_v43 = vld [vmem:[#allocation8 + $0x50] sm:$0xff]  ;;  %v267_v44 = vld [vmem:[#allocation8 + $0x58] sm:$0xff] }
  0x54   :  { %522 = vmatprep.subr.bf16.mxu0 %v683_v1  ;;  %v532_v42 = vpack.c.bf16 %v265_v41, %v264_v40  ;;  %v535_v45 = vpack.c.bf16 %v267_v44, %v266_v43  ;;  %v268_v46 = vld [vmem:[#allocation8 + $0x60] sm:$0xff]  ;;  %v269_v47 = vld [vmem:[#allocation8 + $0x68] sm:$0xff]  ;;  %v380_v49 = vld [vmem:[%s815_s2] ss:$0 sm:$0xff] }
  0x55   :  { %v538_v48 = vpack.c.bf16 %v269_v47, %v268_v46  ;;  %v270_v54 = vld [vmem:[#allocation8 + $0x70] sm:$0xff]  ;;  %v271_v55 = vld [vmem:[#allocation8 + $0x78] sm:$0xff] }
  0x56   :  { %503 = vmatpush3.bf16.msra.mxu1 %v502_v12  ;;  %v541_v56 = vpack.c.bf16 %v271_v55, %v270_v54  ;;  %v382_v57 = vld [vmem:[%s817_s4] ss:$0 sm:$0xff]  ;;  %s684_s4 = smov [#allocation10]  }
  0x57   :  { %504 = vmatprep.subr.bf16.mxu1 %v683_v1  ;;  %524 = vmatpush3.bf16.msra.mxu0 %v523_v33  ;;  %v383_v0 = vld [vmem:[%s819_s6] ss:$0 sm:$0xff]  ;;  %s369_s29 = sshll.u32 %s684_s4, 4  ;;  %s370_s29 = int_to_ptr.vmem [resolvable:$true] %s369_s29 }
  0x58   :  { %525 = vmatprep.subr.bf16.mxu0 %v683_v1  ;;  %s645_s6 = scalar_lea.vmem %s370_s29, 128  ;;  %p650_p5 = scmp.lt.s32.totalorder %s370_s29, %s370_s29 }
  0x59   :  { %p646_p4 = scmp.ne.s32.totalorder %s370_s29, %s645_s6  ;;  %p651_p6 = scmp.lt.s32.totalorder %s645_s6, %s645_s6 }
  0x5a   :  { %506 = vmatpush3.bf16.msra.mxu1 %v505_v15 }
  0x5b   :  { %507 = vmatprep.subr.bf16.mxu1 %v683_v1  ;;  %527 = vmatpush3.bf16.msra.mxu0 %v526_v36  ;;  %p652_p7 = por %p651_p6, %p650_p5 }
  0x5c   :  { %528 = vmatprep.subr.bf16.mxu0 %v683_v1 }
  0x5d   :  { %p653_p8 = pnand %p652_p7, %p646_p4 }
  0x5e   :  { %509 = vmatpush3.bf16.msra.mxu1 %v508_v18 }
  0x5f   :  { %510 = vmatprep.subr.bf16.mxu1 %v683_v1  ;;  %530 = vmatpush3.bf16.msra.mxu0 %v529_v39 }
  0x60   :  { %531 = vmatprep.subr.bf16.mxu0 %v683_v1 }
  0x62   :  { %512 = vmatpush3.bf16.msra.mxu1 %v511_v21 }
  0x63   :  { %513 = vmatprep.subr.bf16.mxu1 %v683_v1  ;;  %533 = vmatpush3.bf16.msra.mxu0 %v532_v42 }
  0x64   :  { %534 = vmatprep.subr.bf16.mxu0 %v683_v1 }
  0x66   :  { %515 = vmatpush3.bf16.msra.mxu1 %v514_v24 }
  0x67   :  { %516 = vmatprep.subr.bf16.mxu1 %v683_v1  ;;  %536 = vmatpush3.bf16.msra.mxu0 %v535_v45 }
  0x68   :  { %537 = vmatprep.subr.bf16.mxu0 %v683_v1 }
  0x6a   :  { %518 = vmatpush3.bf16.msra.mxu1 %v517_v27 }
  0x6b   :  { %539 = vmatpush3.bf16.msra.mxu0 %v538_v48 }
  0x6c   :  { %540 = vmatprep.subr.bf16.mxu0 %v683_v1 }
  0x6f   :  { %542 = vmatpush3.bf16.msra.mxu0 %v541_v56 }
 0x120   :  { %v157_v50 = vpop.f32.mrb[0].mxu0 }
 0x121   :  { %v158_v51 = vadd.f32 %v380_v49, %v157_v50  ;;  %v424_v52 = vpop.f32.mrb[1].mxu0 }
 0x123   :  { %v161_v53 = vmax.f32 %v158_v51, 0.0 }
 0x125   :  { %458 = vmatmul.mubr.f32.vlgmr.msra.gmra.mrb[0].mxu1 %v161_v53 }
 0x1f8   :  { %v251_v58 = vpop.f32.mrb[0].mxu1 }
 0x1f9   :  { %v252_v59 = vadd.f32 %v382_v57, %v251_v58  ;;  %v459_v60 = vpop.f32.mrb[1].mxu1 }
 0x1fb   :  { %v255_v61 = vmax.f32 %v252_v59, 0.0 }
 0x1fd   :  { %493 = vmatmul.mubr.f32.vlgmr.msra.gmra.mrb[2].mxu0 %v255_v61 }
 0x2d0   :  { %v345_v1 = vpop.f32.mrb[2].mxu0 }
 0x2d1   :  { %v346_v2 = vadd.f32 %v383_v0, %v345_v1  ;;  %v494_v3 = vpop.f32.mrb[3].mxu0 }
 0x2d3   :  { %v352_v4 = vsel %vm351_vm2, %v346_v2, -1e+30 }
 0x2d4   :  { %353 = vmax.xlane.f32.xlu0 %v352_v4 }
 0x361   :  { %v354_v5 = vpop.xlane.xlu0 %353 }
 0x362   :  { %v355_v6 = vsub.f32 %v352_v4, %v354_v5 }
 0x364   :  { %v356_v7 = vmul.f32 1.442695, %v355_v6 }
 0x366   :  { %553 = vpow2.f32 %v356_v7 }
 0x370   :  { %v554_v8 = vpop.eup %553 }
 0x371   :  { %358 = vadd.xlane.f32.xlu0 %v554_v8 }
 0x3fe   :  { %v359_v9 = vpop.xlane.xlu0 %358 }
 0x3ff   :  { %555 = vrcp.f32 %v359_v9 }
 0x409   :  { %v556_v10 = vpop.eup %555 }
 0x40a   :  { %v361_v11 = vmul.f32 %v556_v10, %v554_v8 }
 0x40c   :  { %362 = vst [vmem:[#allocation10] sm:$0xff] %v361_v11 }
 0x40d   :  { %656 = shalt.err (!%p653_p8)
}
 0x40e   :  { %s657_s9 = scalar_lea.hbm %s820_s7, 128 }
 0x40f   :  { %p658_p9 = scmp.ne.s32.totalorder %s820_s7, %s657_s9  ;;  %p661_p10 = scmp.lt.u32.totalorder %s657_s9, %s820_s7 }
 0x411   :  { %p663_p11 = pnand %p661_p10, %p658_p9 }
 0x413   :  { %666 = shalt.err (!%p663_p11)
}
 0x414   :  { %372 = dma.vmem_to_hbm [thread:$0]  %s370_s29, 128, %s820_s7, [#allocation4]  }
 0x415   :  { %673 = dma.done.wait [#allocation4], 128  }
 0x416   :  { %674 = vsyncadd [#allocation4], 4294967168 }
 0x417   :  { %376 = vsyncpa [#allocation3], 1 }
 0x418   :  { %377 = vsyncpa [#allocation6], 1 }
 0x419   :  { %378 = vsyncpa [#allocation9], 1 }
 0x41a   :  { %379 = vsyncpa [#allocation4], 1 }

</bundles_post_ra>
